<compile_context>
chip_gen: v6e
topology: v6e:2x2x1
jax: 0.10.0
libtpu: 0.0.40
codegen_flags: <defaults>
</compile_context>

<pallas_src>
import jax
import jax.numpy as jnp
from jax.experimental import pallas as pl
from jax.experimental.pallas import tpu as pltpu


def _centered_dft_matrix(n, inverse=False):
    """Matrix F s.t. F @ x == fftshift(fft(ifftshift(x), norm='ortho')) (or ifft)."""
    eye = jnp.eye(n, dtype=jnp.complex64)
    shifted = jnp.fft.ifftshift(eye, axes=0)
    if inverse:
        f = jnp.fft.ifft(shifted, axis=0, norm="ortho")
    else:
        f = jnp.fft.fft(shifted, axis=0, norm="ortho")
    f = jnp.fft.fftshift(f, axes=0)
    return jnp.real(f).astype(jnp.float32), jnp.imag(f).astype(jnp.float32)


def _pack_const(c_re, c_im, dtype):
    """Pack a constant complex matrix for 3-mult (Gauss) complex matmuls."""
    # NOTE: for production H/W not multiples of (8,128), zero-pad these packs and
    # the H/W block extents to the next aligned size (zero rows/cols keep the
    # valid outputs identical and avoid masked partial stores).
    return jnp.stack([c_re, c_re + c_im, c_im - c_re]).astype(dtype)   # (3, n, n)


def _lmul_const(pack_ref, br, bi):
    """(A_re + i A_im) @ (br + i bi), constant A packed as [re, re+im, im-re].

    3 real matmuls (single MXU pass each when pack dtype is bf16), f32 accumulate:
      P1 = A_re @ (br + bi);  P2 = (A_re + A_im) @ bi;  P3 = (A_im - A_re) @ br
      real = P1 - P2,  imag = P1 + P3
    """
    dt = pack_ref.dtype
    p1 = jnp.dot(pack_ref[0], (br + bi).astype(dt), preferred_element_type=jnp.float32)
    p2 = jnp.dot(pack_ref[1], bi.astype(dt), preferred_element_type=jnp.float32)
    p3 = jnp.dot(pack_ref[2], br.astype(dt), preferred_element_type=jnp.float32)
    return p1 - p2, p1 + p3


def _rmul_const(ar, ai, pack_ref):
    """(ar + i ai) @ (B_re + i B_im), constant B packed as [re, re+im, im-re]."""
    dt = pack_ref.dtype
    p1 = jnp.dot((ar + ai).astype(dt), pack_ref[0], preferred_element_type=jnp.float32)
    p2 = jnp.dot(ai.astype(dt), pack_ref[1], preferred_element_type=jnp.float32)
    p3 = jnp.dot(ar.astype(dt), pack_ref[2], preferred_element_type=jnp.float32)
    return p1 - p2, p1 + p3


def _sense_forward_kernel(img_ref, map_re_ref, map_im_ref, fh_ref, fw_ref, ks_ref):
    # grid = (B, C); one program handles one (batch, coil) pair.
    xr = img_ref[0, 0]                              # (M, H, W) f32
    xi = img_ref[1, 0]
    mr = map_re_ref[0, 0].astype(jnp.float32)       # bf16 maps upcast on the VPU
    mi = map_im_ref[0, 0].astype(jnp.float32)
    # complex multiply image with coil sensitivities, sum over maps dim (VPU)
    cr = jnp.sum(xr * mr - xi * mi, axis=0)         # (H, W)
    ci = jnp.sum(xr * mi + xi * mr, axis=0)
    # centered 2D FFT (ortho) as FH @ X @ FW^T (two 3-mult complex matmuls, MXU)
    ar, ai = _lmul_const(fh_ref, cr, ci)
    yr, yi = _rmul_const(ar, ai, fw_ref)
    ks_ref[0, 0, 0] = yr
    ks_ref[1, 0, 0] = yi


def _sense_adjoint_kernel(ks_ref, map_re_ref, map_im_ref, ifh_ref, ifw_ref, out_ref):
    # grid = (B, S, C//S); the coil-within-split axis is "arbitrary" so the
    # (1,2,1,M,H,W) output block stays resident in VMEM as a private accumulator.
    c = pl.program_id(2)

    kr = ks_ref[0, 0, 0]                            # (H, W)
    ki = ks_ref[1, 0, 0]
    # centered inverse 2D FFT of THIS coil — computed exactly once per coil
    ar, ai = _lmul_const(ifh_ref, kr, ki)
    br, bi = _rmul_const(ar, ai, ifw_ref)
    # multiply by conj(maps) for all M maps
    mr = map_re_ref[0, 0].astype(jnp.float32)       # (M, H, W)
    mi = map_im_ref[0, 0].astype(jnp.float32)
    vr = br[None] * mr + bi[None] * mi
    vi = bi[None] * mr - br[None] * mi

    @pl.when(c == 0)
    def _():                                        # direct write (no zero-init+add)
        out_ref[0, 0, 0] = vr
        out_ref[0, 1, 0] = vi

    @pl.when(c != 0)
    def _():                                        # accumulate over coils
        out_ref[0, 0, 0] = out_ref[0, 0, 0] + vr
        out_ref[0, 1, 0] = out_ref[0, 1, 0] + vi


def _default_vmem_limit():
    """~2/3 of this generation's physical VMEM (v7x 64 MiB -> ~42, v5e/v6e -> ~85)."""
    try:
        cap = int(pltpu.get_tpu_info().vmem_capacity_bytes)
    except Exception:
        cap = 64 * 1024 * 1024
    return max(32 * 1024 * 1024, (cap * 2) // 3)


class SenseModel:
    """JAX/Pallas port of meddlr's SenseModel (complex-as-real inputs).

    maps: (B, H, W, #coils, #maps, 2) float32.
    weights: only ``None`` supported (fully sampled => scalar 1.0).
    compute_dtype: dtype for maps + DFT packs + MXU operands (f32 accumulate).
    adjoint_coil_splits: #partial-sum accumulators on a 'parallel' grid axis
        (default 2 when #coils is even — keeps v7x's 2nd TensorCore busy at B=1).
    # TODO(synk): undersampling-mask `weights` path omitted (weights=None => 1.0).
    """

    def __init__(self, maps, weights=None, compute_dtype=jnp.bfloat16,
                 adjoint_coil_splits=None):
        assert weights is None, "only fully-sampled (weights=None) is implemented"
        B, H, W, C, M, two = maps.shape
        assert two == 2
        self.shape = (B, H, W, C, M)
        self.compute_dtype = jax.dtypes.canonicalize_dtype(compute_dtype)

        # maps in kernel layout (B, C, M, H, W), separate re/im planes, compute_dtype
        m = jnp.transpose(maps.astype(jnp.float32), (0, 3, 4, 1, 2, 5))
        self.map_re = m[..., 0].astype(self.compute_dtype)
        self.map_im = m[..., 1].astype(self.compute_dtype)

        # constant centered-DFT matrices, packed for 3-mult complex matmuls
        fh_re, fh_im = _centered_dft_matrix(H, inverse=False)
        fw_re, fw_im = _centered_dft_matrix(W, inverse=False)
        ifh_re, ifh_im = _centered_dft_matrix(H, inverse=True)
        ifw_re, ifw_im = _centered_dft_matrix(W, inverse=True)
        self.fh_pack = _pack_const(fh_re, fh_im, self.compute_dtype)     # left:  FH @ X
        self.fw_pack = _pack_const(fw_re.T, fw_im.T, self.compute_dtype)  # right: X @ FW^T
        self.ifh_pack = _pack_const(ifh_re, ifh_im, self.compute_dtype)
        self.ifw_pack = _pack_const(ifw_re.T, ifw_im.T, self.compute_dtype)

        if adjoint_coil_splits is None:
            adjoint_coil_splits = 2 if (C % 2 == 0 and C >= 2) else 1
        assert C % adjoint_coil_splits == 0
        self.adjoint_splits = int(adjoint_coil_splits)

        self.vmem_limit = _default_vmem_limit()

    # ------- channel-first (kernel-layout) entry points: no wrapper transposes ----
    def forward_channel_first(self, image_cf):
        """image_cf (2,B,M,H,W) f32 -> kspace (2,B,C,H,W) f32."""
        B, H, W, C, M = self.shape
        isz = self.compute_dtype.itemsize
        flops = B * C * (6 * H * W * (H + W) + 8 * M * H * W)
        bytes_accessed = (2 * B * M * H * W * 4            # image read (f32)
                          + 2 * B * C * M * H * W * isz    # maps read (compute_dtype)
                          + 2 * B * C * H * W * 4          # kspace write (f32)
                          + 3 * (H * H + W * W) * isz)     # DFT packs

        return pl.pallas_call(
            _sense_forward_kernel,
            out_shape=jax.ShapeDtypeStruct((2, B, C, H, W), jnp.float32),
            grid_spec=pltpu.PrefetchScalarGridSpec(
                num_scalar_prefetch=0, grid=(B, C),
                in_specs=[
                    pl.BlockSpec((2, 1, M, H, W), lambda b, c: (0, b, 0, 0, 0)),
                    pl.BlockSpec((1, 1, M, H, W), lambda b, c: (b, c, 0, 0, 0)),
                    pl.BlockSpec((1, 1, M, H, W), lambda b, c: (b, c, 0, 0, 0)),
                    pl.BlockSpec((3, H, H), lambda b, c: (0, 0, 0)),
                    pl.BlockSpec((3, W, W), lambda b, c: (0, 0, 0)),
                ],
                out_specs=pl.BlockSpec((2, 1, 1, H, W),
                                       lambda b, c: (0, b, c, 0, 0))),
            compiler_params=pltpu.CompilerParams(
                dimension_semantics=("parallel", "parallel"),
                vmem_limit_bytes=self.vmem_limit),
            cost_estimate=pl.CostEstimate(flops=flops, transcendentals=0,
                                          bytes_accessed=bytes_accessed),
        )(image_cf, self.map_re, self.map_im, self.fh_pack, self.fw_pack)

    def adjoint_channel_first(self, kspace_cf):
        """kspace_cf (2,B,C,H,W) f32 -> image (2,B,M,H,W) f32."""
        B, H, W, C, M = self.shape
        S = self.adjoint_splits
        cs = C // S
        isz = self.compute_dtype.itemsize
        flops = B * C * (6 * H * W * (H + W) + 8 * M * H * W)
        bytes_accessed = (2 * B * C * H * W * 4            # kspace read (f32)
                          + 2 * B * C * M * H * W * isz    # maps read (compute_dtype)
                          + S * 2 * B * M * H * W * 4      # partial-sum writes (f32)
                          + 3 * (H * H + W * W) * isz)     # DFT packs

        parts = pl.pallas_call(
            _sense_adjoint_kernel,
            out_shape=jax.ShapeDtypeStruct((S, 2, B, M, H, W), jnp.float32),
            grid_spec=pltpu.PrefetchScalarGridSpec(
                num_scalar_prefetch=0, grid=(B, S, cs),
                in_specs=[
                    pl.BlockSpec((2, 1, 1, H, W),
                                 lambda b, s, c: (0, b, s * cs + c, 0, 0)),
                    pl.BlockSpec((1, 1, M, H, W),
                                 lambda b, s, c: (b, s * cs + c, 0, 0, 0)),
                    pl.BlockSpec((1, 1, M, H, W),
                                 lambda b, s, c: (b, s * cs + c, 0, 0, 0)),
                    pl.BlockSpec((3, H, H), lambda b, s, c: (0, 0, 0)),
                    pl.BlockSpec((3, W, W), lambda b, s, c: (0, 0, 0)),
                ],
                # output block index is constant along the (sequential) coil axis
                # -> per-(b, split) private accumulator; never shared across cores
                out_specs=pl.BlockSpec((1, 2, 1, M, H, W),
                                       lambda b, s, c: (s, 0, b, 0, 0, 0))),
            compiler_params=pltpu.CompilerParams(
                dimension_semantics=("parallel", "parallel", "arbitrary"),
                vmem_limit_bytes=self.vmem_limit),
            cost_estimate=pl.CostEstimate(flops=flops, transcendentals=0,
                                          bytes_accessed=bytes_accessed),
        )(kspace_cf, self.map_re, self.map_im, self.ifh_pack, self.ifw_pack)

        return jnp.sum(parts, axis=0)   # cheap XLA add of per-split partial sums

    # --------------------- original module-layout API ----------------------------
    def __call__(self, x, adjoint=False):
        if adjoint:
            ks = jnp.transpose(x.astype(jnp.float32), (4, 0, 3, 1, 2))  # (2,B,C,H,W)
            out = self.adjoint_channel_first(ks)                        # (2,B,M,H,W)
            return jnp.transpose(out, (1, 3, 4, 2, 0))                  # (B,H,W,M,2)
        img = jnp.transpose(x.astype(jnp.float32), (4, 0, 3, 1, 2))     # (2,B,M,H,W)
        out = self.forward_channel_first(img)                           # (2,B,C,H,W)
        return jnp.transpose(out, (1, 3, 4, 2, 0))                      # (B,H,W,C,2)


if __name__ == "__main__":
    key = jax.random.PRNGKey(0)
    B, H, W, C, M = 2, 16, 16, 4, 2
    k1, k2, k3 = jax.random.split(key, 3)
    maps = jax.random.normal(k1, (B, H, W, C, M, 2), jnp.float32)
    image = jax.random.normal(k2, (B, H, W, M, 2), jnp.float32)
    kspace = jax.random.normal(k3, (B, H, W, C, 2), jnp.float32)

    # ---- pure-JAX FFT reference ----
    def fft2c(x):
        return jnp.fft.fftshift(
            jnp.fft.fft2(jnp.fft.ifftshift(x, axes=(1, 2)), axes=(1, 2), norm="ortho"),
            axes=(1, 2))

    def ifft2c(x):
        return jnp.fft.fftshift(
            jnp.fft.ifft2(jnp.fft.ifftshift(x, axes=(1, 2)), axes=(1, 2), norm="ortho"),
            axes=(1, 2))

    maps_c = maps[..., 0] + 1j * maps[..., 1]          # (B,H,W,C,M)
    img_c = image[..., 0] + 1j * image[..., 1]         # (B,H,W,M)
    ks_c = kspace[..., 0] + 1j * kspace[..., 1]        # (B,H,W,C)
    ref_ks = fft2c(jnp.sum(img_c[..., None, :] * maps_c, axis=-1))            # forward
    ref_img = jnp.sum(ifft2c(ks_c)[..., None] * jnp.conj(maps_c), axis=-2)    # adjoint

    def to_c(x):
        return x[..., 0] + 1j * x[..., 1]

    def rel_err(a, b):
        return float(jnp.linalg.norm(a - b) / jnp.linalg.norm(b))

    # Default production config: bf16 maps + single-pass bf16 MXU, f32 accumulate.
    model = SenseModel(maps)                       # weights=None => fully sampled
    ks_out = model(image, adjoint=False)           # (B, H, W, C, 2)
    jax.block_until_ready(ks_out)
    img_out = model(kspace, adjoint=True)          # (B, H, W, M, 2)
    jax.block_until_ready(img_out)
    assert rel_err(to_c(ks_out), ref_ks) < 5e-2, "forward (bf16) mismatch"
    assert rel_err(to_c(img_out), ref_img) < 5e-2, "adjoint (bf16) mismatch"

    # Accuracy-critical config: full float32 compute path through the same kernels.
    model_f32 = SenseModel(maps, compute_dtype=jnp.float32)
    ks32 = model_f32(image, adjoint=False)
    jax.block_until_ready(ks32)
    img32 = model_f32(kspace, adjoint=True)
    jax.block_until_ready(img32)
    assert rel_err(to_c(ks32), ref_ks) < 1e-2, "forward (f32) mismatch"
    assert rel_err(to_c(img32), ref_img) < 1e-2, "adjoint (f32) mismatch"

    print("KERNEL_OK")
</pallas_src>

<mosaic_0001>
module attributes {stable_mosaic.version = 11 : i64} {
  func.func @_sense_forward_kernel(%arg0: i32, %arg1: i32, %arg2: memref<2x1x2x16x16xf32, #tpu.memory_space<vmem>>, %arg3: memref<1x1x2x16x16xbf16, #tpu.memory_space<vmem>>, %arg4: memref<1x1x2x16x16xbf16, #tpu.memory_space<vmem>>, %arg5: memref<3x16x16xbf16, #tpu.memory_space<vmem>>, %arg6: memref<3x16x16xbf16, #tpu.memory_space<vmem>>, %arg7: memref<2x1x1x16x16xf32, #tpu.memory_space<vmem>>) attributes {dimension_semantics = [#tpu.dimension_semantics<parallel>, #tpu.dimension_semantics<parallel>], iteration_bounds = array<i64: 2, 4>, scalar_prefetch = 0 : i64, scratch_operands = 0 : i64, tpu.core_type = #tpu.core_type<tc>, window_params = [{transform_indices = @transform_0, window_bounds = array<i64: 2, 1, 2, 16, 16>}, {transform_indices = @transform_1, window_bounds = array<i64: 1, 1, 2, 16, 16>}, {transform_indices = @transform_2, window_bounds = array<i64: 1, 1, 2, 16, 16>}, {pipeline_mode = #tpu.pipeline_mode<synchronous>, transform_indices = @transform_3, window_bounds = array<i64: 3, 16, 16>}, {pipeline_mode = #tpu.pipeline_mode<synchronous>, transform_indices = @transform_4, window_bounds = array<i64: 3, 16, 16>}, {transform_indices = @transform_5, window_bounds = array<i64: 2, 1, 1, 16, 16>}]} {
    %c0 = arith.constant 0 : index
    %c0_0 = arith.constant 0 : index
    %c0_1 = arith.constant 0 : index
    %c0_2 = arith.constant 0 : index
    %c0_3 = arith.constant 0 : index
    %0 = vector.load %arg2[%c0, %c0_0, %c0_1, %c0_2, %c0_3] : memref<2x1x2x16x16xf32, #tpu.memory_space<vmem>>, vector<1x1x2x16x16xf32>
    %1 = vector.shape_cast %0 : vector<1x1x2x16x16xf32> to vector<2x16x16xf32>
    %c1 = arith.constant 1 : index
    %c0_4 = arith.constant 0 : index
    %c0_5 = arith.constant 0 : index
    %c0_6 = arith.constant 0 : index
    %c0_7 = arith.constant 0 : index
    %2 = vector.load %arg2[%c1, %c0_4, %c0_5, %c0_6, %c0_7] : memref<2x1x2x16x16xf32, #tpu.memory_space<vmem>>, vector<1x1x2x16x16xf32>
    %3 = vector.shape_cast %2 : vector<1x1x2x16x16xf32> to vector<2x16x16xf32>
    %c0_8 = arith.constant 0 : index
    %c0_9 = arith.constant 0 : index
    %c0_10 = arith.constant 0 : index
    %c0_11 = arith.constant 0 : index
    %c0_12 = arith.constant 0 : index
    %4 = vector.load %arg3[%c0_8, %c0_9, %c0_10, %c0_11, %c0_12] : memref<1x1x2x16x16xbf16, #tpu.memory_space<vmem>>, vector<1x1x2x16x16xbf16>
    %5 = vector.shape_cast %4 : vector<1x1x2x16x16xbf16> to vector<2x16x16xbf16>
    %6 = arith.extf %5 : vector<2x16x16xbf16> to vector<2x16x16xf32>
    %c0_13 = arith.constant 0 : index
    %c0_14 = arith.constant 0 : index
    %c0_15 = arith.constant 0 : index
    %c0_16 = arith.constant 0 : index
    %c0_17 = arith.constant 0 : index
    %7 = vector.load %arg4[%c0_13, %c0_14, %c0_15, %c0_16, %c0_17] : memref<1x1x2x16x16xbf16, #tpu.memory_space<vmem>>, vector<1x1x2x16x16xbf16>
    %8 = vector.shape_cast %7 : vector<1x1x2x16x16xbf16> to vector<2x16x16xbf16>
    %9 = arith.extf %8 : vector<2x16x16xbf16> to vector<2x16x16xf32>
    %10 = arith.mulf %1, %6 : vector<2x16x16xf32>
    %11 = arith.mulf %3, %9 : vector<2x16x16xf32>
    %12 = arith.subf %10, %11 : vector<2x16x16xf32>
    %cst = arith.constant dense<0.000000e+00> : vector<16x16xf32>
    %13 = vector.multi_reduction <add>, %12, %cst [0] : vector<2x16x16xf32> to vector<16x16xf32>
    %14 = arith.mulf %1, %9 : vector<2x16x16xf32>
    %15 = arith.mulf %3, %6 : vector<2x16x16xf32>
    %16 = arith.addf %14, %15 : vector<2x16x16xf32>
    %cst_18 = arith.constant dense<0.000000e+00> : vector<16x16xf32>
    %17 = vector.multi_reduction <add>, %16, %cst_18 [0] : vector<2x16x16xf32> to vector<16x16xf32>
    %c0_19 = arith.constant 0 : index
    %c0_20 = arith.constant 0 : index
    %c0_21 = arith.constant 0 : index
    %18 = vector.load %arg5[%c0_19, %c0_20, %c0_21] : memref<3x16x16xbf16, #tpu.memory_space<vmem>>, vector<1x16x16xbf16>
    %19 = vector.shape_cast %18 : vector<1x16x16xbf16> to vector<16x16xbf16>
    %20 = arith.addf %13, %17 : vector<16x16xf32>
    %21 = arith.truncf %20 : vector<16x16xf32> to vector<16x16xbf16>
    %cst_22 = arith.constant dense<0.000000e+00> : vector<16x16xf32>
    %22 = tpu.matmul %19, %21, %cst_22 {dimension_numbers = #tpu.dot_dimension_numbers<[1], [0], [0], [1], [0, 0, 1, 1], [], []>} : vector<16x16xbf16>, vector<16x16xbf16>, vector<16x16xf32> -> vector<16x16xf32>
    %c1_23 = arith.constant 1 : index
    %c0_24 = arith.constant 0 : index
    %c0_25 = arith.constant 0 : index
    %23 = vector.load %arg5[%c1_23, %c0_24, %c0_25] : memref<3x16x16xbf16, #tpu.memory_space<vmem>>, vector<1x16x16xbf16>
    %24 = vector.shape_cast %23 : vector<1x16x16xbf16> to vector<16x16xbf16>
    %25 = arith.truncf %17 : vector<16x16xf32> to vector<16x16xbf16>
    %cst_26 = arith.constant dense<0.000000e+00> : vector<16x16xf32>
    %26 = tpu.matmul %24, %25, %cst_26 {dimension_numbers = #tpu.dot_dimension_numbers<[1], [0], [0], [1], [0, 0, 1, 1], [], []>} : vector<16x16xbf16>, vector<16x16xbf16>, vector<16x16xf32> -> vector<16x16xf32>
    %c2 = arith.constant 2 : index
    %c0_27 = arith.constant 0 : index
    %c0_28 = arith.constant 0 : index
    %27 = vector.load %arg5[%c2, %c0_27, %c0_28] : memref<3x16x16xbf16, #tpu.memory_space<vmem>>, vector<1x16x16xbf16>
    %28 = vector.shape_cast %27 : vector<1x16x16xbf16> to vector<16x16xbf16>
    %29 = arith.truncf %13 : vector<16x16xf32> to vector<16x16xbf16>
    %cst_29 = arith.constant dense<0.000000e+00> : vector<16x16xf32>
    %30 = tpu.matmul %28, %29, %cst_29 {dimension_numbers = #tpu.dot_dimension_numbers<[1], [0], [0], [1], [0, 0, 1, 1], [], []>} : vector<16x16xbf16>, vector<16x16xbf16>, vector<16x16xf32> -> vector<16x16xf32>
    %31 = arith.subf %22, %26 : vector<16x16xf32>
    %32 = arith.addf %22, %30 : vector<16x16xf32>
    %33 = arith.addf %31, %32 : vector<16x16xf32>
    %34 = arith.truncf %33 : vector<16x16xf32> to vector<16x16xbf16>
    %c0_30 = arith.constant 0 : index
    %c0_31 = arith.constant 0 : index
    %c0_32 = arith.constant 0 : index
    %35 = vector.load %arg6[%c0_30, %c0_31, %c0_32] : memref<3x16x16xbf16, #tpu.memory_space<vmem>>, vector<1x16x16xbf16>
    %36 = vector.shape_cast %35 : vector<1x16x16xbf16> to vector<16x16xbf16>
    %cst_33 = arith.constant dense<0.000000e+00> : vector<16x16xf32>
    %37 = tpu.matmul %34, %36, %cst_33 {dimension_numbers = #tpu.dot_dimension_numbers<[1], [0], [0], [1], [0, 0, 1, 1], [], []>} : vector<16x16xbf16>, vector<16x16xbf16>, vector<16x16xf32> -> vector<16x16xf32>
    %38 = arith.truncf %32 : vector<16x16xf32> to vector<16x16xbf16>
    %c1_34 = arith.constant 1 : index
    %c0_35 = arith.constant 0 : index
    %c0_36 = arith.constant 0 : index
    %39 = vector.load %arg6[%c1_34, %c0_35, %c0_36] : memref<3x16x16xbf16, #tpu.memory_space<vmem>>, vector<1x16x16xbf16>
    %40 = vector.shape_cast %39 : vector<1x16x16xbf16> to vector<16x16xbf16>
    %cst_37 = arith.constant dense<0.000000e+00> : vector<16x16xf32>
    %41 = tpu.matmul %38, %40, %cst_37 {dimension_numbers = #tpu.dot_dimension_numbers<[1], [0], [0], [1], [0, 0, 1, 1], [], []>} : vector<16x16xbf16>, vector<16x16xbf16>, vector<16x16xf32> -> vector<16x16xf32>
    %42 = arith.truncf %31 : vector<16x16xf32> to vector<16x16xbf16>
    %c2_38 = arith.constant 2 : index
    %c0_39 = arith.constant 0 : index
    %c0_40 = arith.constant 0 : index
    %43 = vector.load %arg6[%c2_38, %c0_39, %c0_40] : memref<3x16x16xbf16, #tpu.memory_space<vmem>>, vector<1x16x16xbf16>
    %44 = vector.shape_cast %43 : vector<1x16x16xbf16> to vector<16x16xbf16>
    %cst_41 = arith.constant dense<0.000000e+00> : vector<16x16xf32>
    %45 = tpu.matmul %42, %44, %cst_41 {dimension_numbers = #tpu.dot_dimension_numbers<[1], [0], [0], [1], [0, 0, 1, 1], [], []>} : vector<16x16xbf16>, vector<16x16xbf16>, vector<16x16xf32> -> vector<16x16xf32>
    %46 = arith.subf %37, %41 : vector<16x16xf32>
    %47 = arith.addf %37, %45 : vector<16x16xf32>
    %c0_42 = arith.constant 0 : index
    %c0_43 = arith.constant 0 : index
    %c0_44 = arith.constant 0 : index
    %c0_45 = arith.constant 0 : index
    %c0_46 = arith.constant 0 : index
    %48 = vector.load %arg7[%c0_42, %c0_43, %c0_44, %c0_45, %c0_46] : memref<2x1x1x16x16xf32, #tpu.memory_space<vmem>>, vector<1x1x1x16x16xf32>
    %49 = vector.shape_cast %48 : vector<1x1x1x16x16xf32> to vector<16x16xf32>
    %50 = vector.shape_cast %46 : vector<16x16xf32> to vector<1x1x1x16x16xf32>
    tpu.vector_store %arg7[%c0_42, %c0_43, %c0_44, %c0_45, %c0_46], %50 {strides = array<i32>} : memref<2x1x1x16x16xf32, #tpu.memory_space<vmem>>, vector<1x1x1x16x16xf32>,
    %c1_47 = arith.constant 1 : index
    %c0_48 = arith.constant 0 : index
    %c0_49 = arith.constant 0 : index
    %c0_50 = arith.constant 0 : index
    %c0_51 = arith.constant 0 : index
    %51 = vector.load %arg7[%c1_47, %c0_48, %c0_49, %c0_50, %c0_51] : memref<2x1x1x16x16xf32, #tpu.memory_space<vmem>>, vector<1x1x1x16x16xf32>
    %52 = vector.shape_cast %51 : vector<1x1x1x16x16xf32> to vector<16x16xf32>
    %53 = vector.shape_cast %47 : vector<16x16xf32> to vector<1x1x1x16x16xf32>
    tpu.vector_store %arg7[%c1_47, %c0_48, %c0_49, %c0_50, %c0_51], %53 {strides = array<i32>} : memref<2x1x1x16x16xf32, #tpu.memory_space<vmem>>, vector<1x1x1x16x16xf32>,
    return
  }
  func.func @transform_0(%arg0: i32, %arg1: i32) -> (i32, i32, i32, i32, i32) {
    %c0_i32 = arith.constant 0 : i32
    %c0_i32_0 = arith.constant 0 : i32
    %c0_i32_1 = arith.constant 0 : i32
    %c0_i32_2 = arith.constant 0 : i32
    %c0_i32_3 = arith.constant 0 : i32
    return %c0_i32, %arg0, %c0_i32_0, %c0_i32_1, %c0_i32_2 : i32, i32, i32, i32, i32
  }
  func.func @transform_1(%arg0: i32, %arg1: i32) -> (i32, i32, i32, i32, i32) {
    %c0_i32 = arith.constant 0 : i32
    %c0_i32_0 = arith.constant 0 : i32
    %c0_i32_1 = arith.constant 0 : i32
    %c0_i32_2 = arith.constant 0 : i32
    return %arg0, %arg1, %c0_i32, %c0_i32_0, %c0_i32_1 : i32, i32, i32, i32, i32
  }
  func.func @transform_2(%arg0: i32, %arg1: i32) -> (i32, i32, i32, i32, i32) {
    %c0_i32 = arith.constant 0 : i32
    %c0_i32_0 = arith.constant 0 : i32
    %c0_i32_1 = arith.constant 0 : i32
    %c0_i32_2 = arith.constant 0 : i32
    return %arg0, %arg1, %c0_i32, %c0_i32_0, %c0_i32_1 : i32, i32, i32, i32, i32
  }
  func.func @transform_3(%arg0: i32, %arg1: i32) -> (i32, i32, i32) {
    %c0_i32 = arith.constant 0 : i32
    %c0_i32_0 = arith.constant 0 : i32
    %c0_i32_1 = arith.constant 0 : i32
    %c0_i32_2 = arith.constant 0 : i32
    return %c0_i32, %c0_i32_0, %c0_i32_1 : i32, i32, i32
  }
  func.func @transform_4(%arg0: i32, %arg1: i32) -> (i32, i32, i32) {
    %c0_i32 = arith.constant 0 : i32
    %c0_i32_0 = arith.constant 0 : i32
    %c0_i32_1 = arith.constant 0 : i32
    %c0_i32_2 = arith.constant 0 : i32
    return %c0_i32, %c0_i32_0, %c0_i32_1 : i32, i32, i32
  }
  func.func @transform_5(%arg0: i32, %arg1: i32) -> (i32, i32, i32, i32, i32) {
    %c0_i32 = arith.constant 0 : i32
    %c0_i32_0 = arith.constant 0 : i32
    %c0_i32_1 = arith.constant 0 : i32
    %c0_i32_2 = arith.constant 0 : i32
    return %c0_i32, %arg0, %arg1, %c0_i32_0, %c0_i32_1 : i32, i32, i32, i32, i32
  }
}

</mosaic_0001>

<bundles_post_ra>
// kernel: tpu_custom_call.1
= control target key start
LH: loop header
LB: loop body
LE: loop exit
PB: predicated region body
PF: predicated region fallthrough
CT: control target
= control target key end

     0   :  { %s1861_s0 = inlined_call_operand.hbm [shape: f32[2,2,2,16,16], index: 0, kind: input, shape index: {}]   ;;  %s1862_s1 = inlined_call_operand.hbm [shape: bf16[2,4,2,16,16], index: 1, kind: input, shape index: {}]   ;;  %s1863_s2 = inlined_call_operand.hbm [shape: bf16[2,4,2,16,16], index: 2, kind: input, shape index: {}]   ;;  %s1864_s3 = inlined_call_operand.hbm [shape: bf16[3,16,16], index: 3, kind: input, shape index: {}]   ;;  %s1865_s4 = inlined_call_operand.hbm [shape: bf16[3,16,16], index: 4, kind: input, shape index: {}]   ;;  %s1866_s5 = inlined_call_operand.hbm [shape: f32[2,2,4,16,16], index: 5, kind: output, shape index: {}]  }
   0x1   :  { %1879 = sst [smem:[#allocation29_spill]] %s1861_s0 }
   0x2   :  { %1880 = sst [smem:[#allocation30_spill]] %s1864_s3 }
   0x3   :  { %1881 = sst [smem:[#allocation31_spill]] %s1865_s4 }
   0x4   :  { %1882 = sst [smem:[#allocation32_spill]] %s1866_s5 }
   0x5   :  { %10 = vsyncpa [#allocation3], 0 }
   0x6   :  { %12 = vsyncpa [#allocation3 + $0x1], 0 }
   0x7   :  { %13 = vsyncpa [#allocation6], 0 }
   0x8   :  { %15 = vsyncpa [#allocation6 + $0x1], 0 }
   0x9   :  { %16 = vsyncpa [#allocation9], 0 }
   0xa   :  { %17 = vsyncpa [#allocation4], 0 }
   0xb   :  { %19 = vsyncpa [#allocation4 + $0x1], 0  ;;  %s1527_s18 = smov 0   ;;  %s1529_s19 = smov 0  }
   0xc   :  { %s1531_s20 = smov 0   ;;  %s1533_s21 = smov 0  }
   0xd   :  { %s1535_s22 = smov 0   ;;  %s1537_s23 = smov 0  }
   0xe   :  { %s1539_s24 = smov 0   ;;  %s1541_s25 = smov 0  }
   0xf   :  { %s1543_s26 = smov 0   ;;  %s1545_s27 = smov 0  }
  0x10   :  { %s1547_s28 = smov 0  }
  0x11 LB: > { %1883 = sst [smem:[#allocation21_spill]] %s1432_s18  ;;  %s1581_s29 = sadd.s32 4294967295, %s1472_s28   ;;  %s1472_s28 = sphi %s1547_s28, %s25_s28   ;;  %s1468_s27 = sphi %s1545_s27, %s1927_s27   ;;  %s1464_s26 = sphi %s1543_s26, %s1926_s26   ;;  %s1460_s25 = sphi %s1541_s25, %s1925_s25   ;;  %s1456_s24 = sphi %s1539_s24, %s1924_s24   ;;  %s1452_s23 = sphi %s1537_s23, %s1916_s23   ;;  %s1448_s22 = sphi %s1535_s22, %s1923_s22   ;;  %s1444_s21 = sphi %s1533_s21, %s1922_s21   ;;  %s1440_s20 = sphi %s1531_s20, %s1921_s20   ;;  %s1436_s19 = sphi %s1529_s19, %s1920_s19   ;;  %s1432_s18 = sphi %s1527_s18, %s1919_s18  }
  0x12   : > { %1884 = sst [smem:[#allocation22_spill]] %s1452_s23  ;;  %s990_s30 = sadd.s32 4294967294, %s1472_s28  }
  0x13   : > { %s34_s6 = sadd.s32 1, %s1464_s26  ;;  %s37_s7 = sadd.s32 1, %s1468_s27 }
  0x14   : > { %p35_p0 = scmp.ge.s32.totalorder %s34_s6, 4  ;;  %s44_s8 = sadd.s32 1, %s1452_s23 }
  0x15   : > { %p51_p1 = scmp.ne.s32.totalorder %s1452_s23, %s1448_s22  ;;  %p52_p2 = scmp.eq.s32.totalorder %s1472_s28, 0 }
  0x16   : > { %s1929_s6 = smov (%p35_p0, %s34_s6), 0  ;;  %s1931_s7 = smov (!%p35_p0, %s37_s7), %s1468_s27 }
  0x17   : > { %1885 = sst [smem:[#allocation23_spill]] %s1929_s6  ;;  %p1595_p3 = por %p52_p2, %p51_p1 }
  0x18   : > { %p57_p4 = scmp.ne.s32.totalorder %s1448_s22, %s1444_s21  ;;  %p39_p5 = scmp.ge.s32.totalorder %s1931_s7, 2 }
  0x19   : > { %p1867_p6 = scmp.eq.s32.totalorder %s1581_s29, 0  ;;  %s68_s10 = ssub.s32 %s1464_s26, %s1929_s6 }
  0x1a   : > { %s72_s11 = sadd.s32 1, %s1440_s20  ;;  %s1933_s7 = smov (%p39_p5, %s1931_s7), 0 }
  0x1b   : > { %1887 = sst [smem:[#allocation24_spill]] %s1933_s7  ;;  %p1608_p7 = por %p1867_p6, %p57_p4 }
  0x1c   : > { %p79_p8 = scmp.ne.s32.totalorder %s1440_s20, %s1436_s19  ;;  %s41_s13 = ssub.s32 %s1468_s27, %s1933_s7 }
  0x1d   : > { %s1888_s12 = scalar_select %p1608_p7, 1, 0 }
  0x1e   : > { %p85_p9 = scmp.ne.s32.totalorder %s1436_s19, %s1432_s18  ;;  %p42_p10 = scmp.eq.s32.totalorder %s41_s13, 0 }
  0x1f   : > { %s69_s14 = sor.u32 %s68_s10, %s41_s13  ;;  %p1623_p12 = por %p79_p8, %p52_p2 }
  0x20   : > { %p70_p11 = scmp.eq.s32.totalorder %s69_s14, 0  ;;  %p1638_p13 = por %p85_p9, %p1867_p6 }
  0x21   : > { %s1628_s16 = scalar_select %p42_p10, %s1452_s23, %s44_s8  }
  0x22   : > { %s1631_s17 = scalar_select %p70_p11, %s1440_s20, %s72_s11  }
  0x23   : > { %1890 = sst [smem:[#allocation25_spill]] %s1628_s16  ;;  %p181_p0 = scmp.eq.s32.totalorder %s1581_s29, 7 }
  0x24   : > { %1891 = sst [smem:[#allocation26_spill]] %s1631_s17  ;;  %p187_p1 = scmp.eq.s32.totalorder %s990_s30, 7 }
  0x25   : > { %s1892_s21 = scalar_select %p1638_p13, 1, 0 }
  0x26   : > { %p991_p4 = scmp.ge.s32.totalorder %s1472_s28, 1  ;;  %p1647_p5 = por %p181_p0, %p79_p8 }
  0x27   : > { %p194_p2 = scmp.lt.s32.totalorder %s1472_s28, 9  ;;  %p1655_p10 = por %p187_p1, %p85_p9 }
  0x28   : > { %s1893_s10 = scalar_select %p1647_p5, 1, 0 }
  0x29   : > { %s1895_s8 = scalar_select %p1655_p10, 1, 0 }
  0x2a   : > { %1894 = sst [smem:[#allocation27_spill]] %s1893_s10  ;;  %p1659_p11 = pnand %p991_p4, %p194_p2 }
  0x2b   : > { %1896 = sst [smem:[#allocation28_spill]] %s1895_s8  ;;  %s1474_s13 = smov [#allocation8]  }
  0x2c   : > { %s1897_s11 = scalar_select %p1659_p11, 1, 0 }
  0x2d   : > { %s206_s14 = sshll.u32 %s1474_s13, 4  ;;  %p1135_p6 = pneg %p1659_p11  ;;  %s207_s14 = int_to_ptr.vmem [resolvable:$true] %s206_s14 }
  0x2e   : > { %p1898_p8 = scmp.eq.s32.totalorder %s1581_s29, 0  ;;  %s1475_s7 = smov [#allocation10]  }
  0x2f   : > { %s219_s6 = sshll.u32 %s1475_s7, 4  ;;  %s1277_s16 = scalar_lea.vmem %s207_s14, 384  ;;  %s220_s6 = int_to_ptr.vmem [resolvable:$true] %s219_s6 }
  0x30   : > { %p1667_p0 = pnand %p1135_p6, %p1898_p8  ;;  %p1278_p1 = scmp.ne.s32.totalorder %s207_s14, %s1277_s16 }
  0x31   : > { %p1285_p10 = scmp.lt.s32.totalorder %s207_s14, %s207_s14  ;;  %p1286_p5 = scmp.lt.s32.totalorder %s1277_s16, %s1277_s16 }
  0x32   : > { %p1268_p9 = pneg %p1667_p0 }
  0x33   : > { %p1287_p13 = por %p1286_p5, %p1285_p10 }
  0x34   : > { %p1280_p4 = pnand %p1278_p1, %p1268_p9 }
  0x36   : > { %p1281_p2 = pneg %p1280_p4 }
  0x38   : > { %p1288_p6 = pnand %p1287_p13, %p1281_p2 }
  0x3a   : > { %1291 = shalt.err (!%p1288_p6)
}
  0x3b   : > { %s1476_s13 = smov 64   ;;  %s1477_s17 = smov 4  }
  0x3c   : > { %s1900_s3 = sld [smem:[#allocation30_spill]]  ;;  %s1303_s18 = scalar_lea.vmem %s220_s6, 384 }
  0x3d   : > { %p1304_p8 = scmp.ne.s32.totalorder %s220_s6, %s1303_s18  ;;  %p1311_p7 = scmp.lt.s32.totalorder %s220_s6, %s220_s6 }
  0x3e   : > { %p1312_p11 = scmp.lt.s32.totalorder %s1303_s18, %s1303_s18 }
  0x3f   : > { %p1306_p1 = pnand %p1304_p8, %p1268_p9 }
  0x40   : > { %p1313_p5 = por %p1312_p11, %p1311_p7 }
  0x41   : > { %p1307_p4 = pneg %p1306_p1 }
  0x42   : > { %1138 = dma.hbm_to_vmem [thread:$0]  (!%p1667_p0), %s1900_s3, 384, %s207_s14, [#allocation9], %s1476_s13, %s1476_s13, %s1477_s17  }
  0x43   : > { %p1314_p13 = pnand %p1313_p5, %p1307_p4 }
  0x45   : > { %1317 = shalt.err (!%p1314_p13)
}
  0x46   : > { %s1901_s4 = sld [smem:[#allocation31_spill]]  ;;  %p994_p10 = scmp.ge.s32.totalorder %s1472_s28, 8 }
  0x48   : > { %229 = sbr.rel (%p994_p10) target bundleno = 121 (0x79), region = 24 }
  0x4c   : > { %1141 = dma.hbm_to_vmem [thread:$0]  (!%p1667_p0), %s1901_s4, 384, %s220_s6, [#allocation9], %s1476_s13, %s1476_s13, %s1477_s17  }
  0x4d   : > { %s233_s8 = sand.u32 1, %s1452_s23   ;;  %s1039_s18 = sshll.u32 %s1468_s27, 9 }
  0x4e   : > { %s995_s14 = sshll.u32 %s233_s8, 6  ;;  %s1902_s0 = sld [smem:[#allocation29_spill]] }
  0x4f   : > { %s1110_s5 = scalar_select %p1595_p3, [#allocation0], [#allocation16] }
  0x50   : > { %s237_s6 = scalar_lea.vmem [#allocation2], %s995_s14  ;;  %s1478_s16 = smov 1024  }
  0x51   : > { %s256_s17 = sshll.u32 %s237_s6, 4  ;;  %s248_s13 = sld [smem:[%s1110_s5]]   ;;  %s257_s17 = int_to_ptr.vmem [resolvable:$true] %s256_s17 }
  0x52   : > { %1111 = sst [smem:[#allocation13]] (%p1595_p3), %s1478_s16  ;;  %s1479_s4 = smov 512  }
  0x53   : > { %1112 = sst [smem:[#allocation13 + $0x1]] (%p1595_p3), %s1479_s4  ;;  %s1480_s23 = smov 4  }
  0x54   : > { %s243_s3 = scalar_lea.hbm %s1902_s0, %s1039_s18  ;;  %1113 = sst [smem:[#allocation13 + $0x2]] (%p1595_p3), %s1480_s23 }
  0x55   : > { %s1481_s10 = smov 128   ;;  %s1482_s14 = smov 8  }
  0x56   : > { %1114 = sst [smem:[#allocation13 + $0x3]] (%p1595_p3), %s1481_s10  ;;  %s234_s30 = scalar_lea.sflag [#allocation3], %s233_s8 }
  0x57   : > { %1115 = sst [smem:[#allocation13 + $0x4]] (%p1595_p3), %s1481_s10  ;;  %s998_s18 = sshll.u32 %s248_s13, 26 }
  0x58   : > { %1116 = sst [smem:[#allocation13 + $0x5]] (%p1595_p3), %s1482_s14  ;;  %s999_s7 = sadd.s32 134217728, %s998_s18 }
  0x59   : > { %s1483_s5 = smov 131072   ;;  %s279_s4 = sand.u32 1, %s1472_s28  }
  0x5a   : > { %1117 = dma.general (%p1595_p3), %s243_s3, 1024, %s257_s17, %s234_s30, %s1483_s5, [#allocation13], %s999_s7, 0  }
  0x5b   : > { %s281_s23 = sand.u32 1, %s1440_s20   ;;  %s1001_s10 = sshll.u32 %s1464_s26, 2 }
  0x5c   : > { %s1713_s6 = sshll.u32 %s281_s23, 4  ;;  %s1002_s13 = sshll.u32 %s1468_s27, 4 }
  0x5d   : > { %s283_s16 = scalar_lea.vmem [#allocation5], %s1713_s6  ;;  %s289_s14 = sadd.s32 %s1002_s13, %s1001_s10 }
  0x5e   : > { %s292_s0 = sshll.u32 %s283_s16, 4  ;;  %s1003_s8 = sshll.u32 %s289_s14, 6  ;;  %s293_s0 = int_to_ptr.vmem [resolvable:$true] %s292_s0 }
  0x5f   : > { %s291_s3 = scalar_lea.hbm %s1862_s1, %s1003_s8  ;;  %s1721_s17 = scalar_lea.sflag [#allocation6], %s279_s4 }
  0x60   : > { %s1330_s7 = scalar_lea.vmem %s293_s0, 256  ;;  %s1484_s30 = smov [#allocation5]  }
  0x61   : > { %p1331_p3 = scmp.ne.s32.totalorder %s293_s0, %s1330_s7  ;;  %s1334_s5 = sshll.u32 %s1484_s30, 4  ;;  %s1335_s5 = int_to_ptr.vmem [resolvable:$false] %s1334_s5 }
  0x62   : > { %s1336_s23 = scalar_lea.vmem %s1335_s5, 512  ;;  %p1337_p0 = scmp.lt.s32.totalorder %s293_s0, %s1335_s5 }
  0x63   : > { %p1332_p7 = pnand %p1331_p3, %p1623_p12  ;;  %p1338_p9 = scmp.lt.s32.totalorder %s1336_s23, %s1330_s7 }
  0x65   : > { %p1333_p11 = pneg %p1332_p7  ;;  %p1339_p2 = por %p1338_p9, %p1337_p0 }
  0x67   : > { %p1340_p6 = pnand %p1339_p2, %p1333_p11 }
  0x69   : > { %1343 = shalt.err (!%p1340_p6)
}
  0x6a   : > { %s1485_s10 = smov 64   ;;  %s1486_s4 = smov 4  }
  0x6b   : > { %1118 = dma.hbm_to_vmem [thread:$0]  (%p1623_p12), %s291_s3, 256, %s293_s0, %s1721_s17, %s1485_s10, %s1485_s10, %s1486_s4  }
  0x6c   : > { %s314_s14 = scalar_lea.hbm %s1863_s2, %s1003_s8  ;;  %s306_s18 = scalar_lea.vmem [#allocation7], %s1713_s6 }
  0x6d   : > { %s315_s9 = sshll.u32 %s306_s18, 4  ;;  %s1487_s7 = smov [#allocation7]   ;;  %s316_s9 = int_to_ptr.vmem [resolvable:$true] %s315_s9 }
  0x6e   : > { %s1356_s30 = scalar_lea.vmem %s316_s9, 256  ;;  %s1360_s5 = sshll.u32 %s1487_s7, 4  ;;  %s1361_s5 = int_to_ptr.vmem [resolvable:$false] %s1360_s5 }
  0x6f   : > { %p1357_p8 = scmp.ne.s32.totalorder %s316_s9, %s1356_s30  ;;  %s1362_s23 = scalar_lea.vmem %s1361_s5, 512 }
  0x70   : > { %p1363_p5 = scmp.lt.s32.totalorder %s316_s9, %s1361_s5  ;;  %p1364_p13 = scmp.lt.s32.totalorder %s1362_s23, %s1356_s30 }
  0x71   : > { %p1358_p1 = pnand %p1357_p8, %p1623_p12 }
  0x72   : > { %p1365_p10 = por %p1364_p13, %p1363_p5 }
  0x73   : > { %p1359_p4 = pneg %p1358_p1 }
  0x75   : > { %p1366_p3 = pnand %p1365_p10, %p1359_p4 }
  0x77   : > { %1369 = shalt.err (!%p1366_p3)
}
  0x78   : > { %1119 = dma.hbm_to_vmem [thread:$0]  (%p1623_p12), %s314_s14, 256, %s316_s9, %s1721_s17, %s1485_s10, %s1485_s10, %s1486_s4  }
  0x79 PF: > { %p1903_p7 = scmp.ne.s32.totalorder %s1897_s11, 0 }
  0x7a   : > { %s329_s0 = sand.u32 (!%p1903_p7), 1, %s1448_s22   ;;  %p1904_p11 = scmp.ne.s32.totalorder (!%p1903_p7), %s1888_s12, 0 }
  0x7b   : > { %327 = sbr.rel (%p1903_p7) target bundleno = 595 (0x253), region = 40  ;;  %s1009_s6 = sshll.u32 (!%p1903_p7), %s329_s0, 6 }
  0x7c   : > { %s330_s8 = scalar_lea.sflag (!%p1903_p7), [#allocation3], %s329_s0  ;;  %s1740_s3 = scalar_lea.vmem (!%p1903_p7), [#allocation2], %s1009_s6 }
  0x80   : > { %1415 = dma.done.wait (%p1904_p11), %s330_s8, 1024  }
  0x81   : > { %1417 = vsyncadd (%p1904_p11), %s330_s8, 4294966272  ;;  %s338_s15 = sand.u32 1, %s1581_s29   ;;  %s1748_s17 = sand.u32 1, %s1436_s19  }
  0x82   : > { %s1010_s11 = sshll.u32 %s1748_s17, 4  ;;  %s339_s10 = scalar_lea.sflag [#allocation6], %s338_s15 }
  0x83   : > { %s342_s4 = scalar_lea.vmem [#allocation5], %s1010_s11  ;;  %p1905_p12 = scmp.ne.s32.totalorder %s1892_s21, 0 }
  0x85   : > { %1419 = dma.done.wait (%p1905_p12), %s339_s10, 512  }
  0x86   : > { %1421 = vsyncadd (%p1905_p12), %s339_s10, 4294966784  ;;  %s351_s13 = scalar_lea.vmem [#allocation7], %s1010_s11  ;;  %p1906_p0 = scmp.eq.s32.totalorder %s1581_s29, 0 }
  0x88   : > { %1423 = dma.done.wait (%p1906_p0), [#allocation9], 768   ;;  %p1907_p9 = pmov %p1906_p0 }
  0x89   : > { %v1488_v0 = vmov 0.0   ;;  %vm1489_vm0 = vmmov 0   ;;  %v397_v1 = vld [vmem:[%s1740_s3] sm:$0xff]  ;;  %v398_v2 = vld [vmem:[%s1740_s3 + $0x8] sm:$0xff]  ;;  %v399_v3 = vld [vmem:[%s1740_s3 + $0x10] sm:$0xff]  ;;  %vm434_vm1 = vcmask 130048  }
  0x8a   : > { %1425 = vsyncadd (%p1907_p9), [#allocation9], 4294966528  ;;  %1070 = vmatprep.subr.bf16.mxu0 %v1488_v0  ;;  %1076 = vmatprep.subr.bf16.mxu1 %v1488_v0  ;;  %v400_v4 = vld [vmem:[%s1740_s3 + $0x18] sm:$0xff]  ;;  %v1015_v5 = vld [vmem:[%s1740_s3 + $0x20] sm:$0xff]  ;;  %s1014_s29 = sshll.u32 %s1748_s17, 5  ;;  %s796_s21 = scalar_lea.sflag [#allocation4], %s1748_s17 }
  0x8b   : > { %1072 = vmatprep.mubr.msk.bf16.mxu0 %vm1489_vm0, %v1488_v0  ;;  %1078 = vmatprep.mubr.msk.bf16.mxu1 %vm1489_vm0, %v1488_v0  ;;  %v1016_v6 = vld [vmem:[%s1740_s3 + $0x28] sm:$0xff]  ;;  %v1017_v7 = vld [vmem:[%s1740_s3 + $0x30] sm:$0xff]  ;;  %v1018_v14 = vld [vmem:[%s1740_s3 + $0x38] sm:$0xff]  ;;  %s395_s12 = scalar_lea.vmem [#allocation11], %s1014_s29 }
  0x8c   : > { %v1041_v8 = vld [vmem:[%s342_s4] sm:$0xff]   ;;  %v1056_v11 = vld [vmem:[%s342_s4 + $0x8] sm:$0xff]  }
  0x8d   : > { %v1042_v9 = vunpack.c.l.bf16 %v1041_v8  ;;  %v1043_v10 = vunpack.c.h.bf16 %v1041_v8  ;;  %v1049_v12 = vld [vmem:[%s351_s13] sm:$0xff]   ;;  %v1057_v13 = vld [vmem:[%s351_s13 + $0x8] sm:$0xff]   ;;  %v1046_v15 = vunpack.c.l.bf16 %v1056_v11  ;;  %v1047_v16 = vunpack.c.h.bf16 %v1056_v11 }
  0x8e   : > { %v1050_v17 = vunpack.c.l.bf16 %v1049_v12  ;;  %v1051_v18 = vunpack.c.h.bf16 %v1049_v12  ;;  %v1054_v19 = vunpack.c.l.bf16 %v1057_v13  ;;  %v1055_v20 = vunpack.c.h.bf16 %v1057_v13  ;;  %v1261_v60 = vld [vmem:[#allocation8 + $0x8] sm:$0xff]   ;;  %v1260_v62 = vld [vmem:[#allocation8] sm:$0xff]  }
  0x8f   : > { %v422_v21 = vmul.f32 %v1042_v9, %v397_v1  ;;  %v423_v22 = vmul.f32 %v1043_v10, %v398_v2  ;;  %v424_v23 = vmul.f32 %v1046_v15, %v399_v3  ;;  %v425_v24 = vmul.f32 %v1047_v16, %v400_v4 }
  0x90   : > { %v426_v25 = vmul.f32 %v1050_v17, %v1015_v5  ;;  %v427_v26 = vmul.f32 %v1051_v18, %v1016_v6  ;;  %v428_v27 = vmul.f32 %v1054_v19, %v1017_v7  ;;  %v429_v28 = vmul.f32 %v1055_v20, %v1018_v14 }
  0x91   : > { %v441_v29 = vmul.f32 %v1050_v17, %v397_v1  ;;  %v442_v30 = vmul.f32 %v1051_v18, %v398_v2  ;;  %v443_v33 = vmul.f32 %v1054_v19, %v399_v3  ;;  %v444_v34 = vmul.f32 %v1055_v20, %v400_v4  ;;  %v1262_v1 = vld [vmem:[#allocation8 + $0x10] sm:$0xff]   ;;  %v1264_v2 = vld [vmem:[#allocation10 + $0x8] sm:$0xff]   ;;  %v1263_v3 = vld [vmem:[#allocation10] sm:$0xff]  }
  0x92   : > { %v430_v31 = vsub.f32 %v422_v21, %v426_v25  ;;  %v431_v32 = vsub.f32 %v423_v22, %v427_v26  ;;  %v432_v35 = vsub.f32 %v424_v23, %v428_v27  ;;  %v433_v36 = vsub.f32 %v425_v24, %v429_v28  ;;  %v1265_v23 = vld [vmem:[#allocation10 + $0x10] sm:$0xff]  }
  0x93   : > { %v445_v37 = vmul.f32 %v1042_v9, %v1015_v5  ;;  %v446_v38 = vmul.f32 %v1043_v10, %v1016_v6  ;;  %v447_v41 = vmul.f32 %v1046_v15, %v1017_v7  ;;  %v448_v42 = vmul.f32 %v1047_v16, %v1018_v14 }
  0x94   : > { %v435_v39 = vsel %vm434_vm1, %v430_v31, 0.0  ;;  %v438_v40 = vsel %vm434_vm1, %v431_v32, 0.0  ;;  %v436_v43 = vsel %vm434_vm1, %v432_v35, 0.0  ;;  %v439_v44 = vsel %vm434_vm1, %v433_v36, 0.0 }
  0x95   : > { %v449_v45 = vadd.f32 %v445_v37, %v441_v29  ;;  %v450_v46 = vadd.f32 %v446_v38, %v442_v30  ;;  %v451_v47 = vadd.f32 %v447_v41, %v443_v33  ;;  %v452_v48 = vadd.f32 %v448_v42, %v444_v34 }
  0x96   : > { %v437_v49 = vadd.f32 %v436_v43, %v435_v39  ;;  %v440_v50 = vadd.f32 %v439_v44, %v438_v40 }
  0x97   : > { %v453_v51 = vsel %vm434_vm1, %v449_v45, 0.0  ;;  %v456_v52 = vsel %vm434_vm1, %v450_v46, 0.0  ;;  %v454_v53 = vsel %vm434_vm1, %v451_v47, 0.0  ;;  %v457_v54 = vsel %vm434_vm1, %v452_v48, 0.0 }
  0x98   : > { %v455_v55 = vadd.f32 %v454_v53, %v453_v51  ;;  %v458_v56 = vadd.f32 %v457_v54, %v456_v52  ;;  %v569_v63 = vpack.c.bf16 %v440_v50, %v437_v49 }
  0x9a   : > { %v461_v57 = vadd.f32 %v455_v55, %v437_v49  ;;  %v462_v58 = vadd.f32 %v458_v56, %v440_v50  ;;  %v516_v59 = vpack.c.bf16 %v458_v56, %v455_v55 }
  0x9c   : > { %v463_v61 = vpack.c.bf16 %v462_v58, %v461_v57  ;;  %1077 = vmatpush3.bf16.msra.mxu1 %v516_v59 }
  0x9d   : > { %1088 = vmatprep.subr.bf16.mxu1 %v1488_v0 }
  0x9e   : > { %1071 = vmatpush3.bf16.msra.mxu0 %v463_v61 }
  0x9f   : > { %1079 = vmatmul.mubr.msk.bf16.vlgmr.msra.gmra.mxu1 %vm434_vm1, %v1261_v60  ;;  %1082 = vmatprep.subr.bf16.mxu0 %v1488_v0 }
  0xa0   : > { %1090 = vmatprep.mubr.msk.bf16.mxu1 %vm1489_vm0, %v1488_v0  ;;  %1089 = vmatpush3.bf16.msra.mxu1 %v1263_v3 }
  0xa1   : > { %1073 = vmatmul.mubr.msk.bf16.vlgmr.msra.gmra.mxu0 %vm434_vm1, %v1260_v62  ;;  %1100 = vmatprep.subr.bf16.mxu1 %v1488_v0 }
  0xa2   : > { %1083 = vmatpush3.bf16.msra.mxu0 %v569_v63  ;;  %1084 = vmatprep.mubr.msk.bf16.mxu0 %vm1489_vm0, %v1488_v0 }
  0xa3   : > { %1094 = vmatprep.subr.bf16.mxu0 %v1488_v0 }
  0xa9   : > { %1085 = vmatmul.mubr.msk.bf16.vlgmr.msra.gmra.mxu0 %vm434_vm1, %v1262_v1 }
  0xaa   : > { %1096 = vmatprep.mubr.msk.bf16.mxu0 %vm1489_vm0, %v1488_v0  ;;  %1095 = vmatpush3.bf16.msra.mxu0 %v1264_v2 }
 0x15f   : > { %v559_v4 = vpop.f32.mrf.mxu1 }
 0x161   : > { %v506_v5 = vpop.f32.mrf.mxu0  ;;  %v1080_v6 = vpop.f32.mrf.mxu1 }
 0x162   : > { %v619_v16 = vsub.f32 %v506_v5, %v559_v4 }
 0x163   : > { %v1074_v7 = vpop.f32.mrf.mxu0  ;;  %v562_v8 = vpop.f32.mrf.mxu1 }
 0x165   : > { %v509_v9 = vpop.f32.mrf.mxu0  ;;  %v1081_v10 = vpop.f32.mrf.mxu1 }
 0x166   : > { %v620_v17 = vsub.f32 %v509_v9, %v562_v8 }
 0x167   : > { %v1075_v11 = vpop.f32.mrf.mxu0 }
 0x168   : > { %v732_v25 = vpack.c.bf16 %v620_v17, %v619_v16 }
 0x169   : > { %v612_v12 = vpop.f32.mrf.mxu0 }
 0x16a   : > { %v621_v14 = vadd.f32 %v612_v12, %v506_v5 }
 0x16b   : > { %v1086_v13 = vpop.f32.mrf.mxu0 }
 0x16c   : > { %v623_v20 = vadd.f32 %v621_v14, %v619_v16 }
 0x16d   : > { %v615_v15 = vpop.f32.mrf.mxu0 }
 0x16e   : > { %v622_v18 = vadd.f32 %v615_v15, %v509_v9 }
 0x16f   : > { %v1087_v19 = vpop.f32.mrf.mxu0 }
 0x170   : > { %v624_v21 = vadd.f32 %v622_v18, %v620_v17  ;;  %v678_v22 = vpack.c.bf16 %v622_v18, %v621_v14 }
 0x172   : > { %v625_v24 = vpack.c.bf16 %v624_v21, %v623_v20  ;;  %1097 = vmatmul.mubr.msk.bf16.vlgmr.msra.gmra.mxu0 %vm434_vm1, %v678_v22 }
 0x174   : > { %1091 = vmatmul.mubr.msk.bf16.vlgmr.msra.gmra.mxu1 %vm434_vm1, %v625_v24 }
 0x175   : > { %1101 = vmatpush3.bf16.msra.mxu1 %v1265_v23  ;;  %1102 = vmatprep.mubr.msk.bf16.mxu1 %vm1489_vm0, %v1488_v0 }
 0x17c   : > { %1103 = vmatmul.mubr.msk.bf16.vlgmr.msra.gmra.mxu1 %vm434_vm1, %v732_v25 }
 0x232   : > { %v725_v26 = vpop.f32.mrf.mxu0 }
 0x234   : > { %v671_v27 = vpop.f32.mrf.mxu1  ;;  %v1098_v28 = vpop.f32.mrf.mxu0 }
 0x235   : > { %v786_v29 = vsub.f32 %v671_v27, %v725_v26 }
 0x236   : > { %v1092_v30 = vpop.f32.mrf.mxu1  ;;  %v728_v31 = vpop.f32.mrf.mxu0 }
 0x237   : > { %790 = vst.msk [vmem:[%s395_s12] sm:$0xff] %vm434_vm1, %v786_v29 }
 0x238   : > { %v674_v32 = vpop.f32.mrf.mxu1  ;;  %v1099_v33 = vpop.f32.mrf.mxu0 }
 0x239   : > { %v787_v34 = vsub.f32 %v674_v32, %v728_v31 }
 0x23a   : > { %v1093_v35 = vpop.f32.mrf.mxu1 }
 0x23b   : > { %791 = vst.msk [vmem:[%s395_s12 + $0x8] sm:$0xff] %vm434_vm1, %v787_v34 }
 0x23c   : > { %v779_v0 = vpop.f32.mrf.mxu1 }
 0x23d   : > { %v788_v36 = vadd.f32 %v779_v0, %v671_v27 }
 0x23e   : > { %v1104_v37 = vpop.f32.mrf.mxu1 }
 0x23f   : > { %1031 = vst.msk [vmem:[%s395_s12 + $0x10] sm:$0xff] %vm434_vm1, %v788_v36 }
 0x240   : > { %v782_v38 = vpop.f32.mrf.mxu1 }
 0x241   : > { %v789_v39 = vadd.f32 %v782_v38, %v674_v32 }
 0x242   : > { %v1105_v40 = vpop.f32.mrf.mxu1 }
 0x243   : > { %1032 = vst.msk [vmem:[%s395_s12 + $0x18] sm:$0xff] %vm434_vm1, %v789_v39 }
 0x244   : > { %s1908_s16 = sld [smem:[#allocation27_spill]]  ;;  %s1034_s14 = sshll.u32 %s1456_s24, 1 }
 0x245   : > { %s1035_s18 = sshll.u32 %s1460_s25, 3  ;;  %s821_s30 = sshll.u32 %s395_s12, 4  ;;  %s822_s30 = int_to_ptr.vmem [resolvable:$true] %s821_s30 }
 0x246   : > { %s808_s9 = sadd.s32 %s1035_s18, %s1034_s14  ;;  %s1909_s0 = sld [smem:[#allocation32_spill]] }
 0x247   : > { %s1036_s7 = sshll.u32 %s808_s9, 7  ;;  %s1490_s8 = smov 256  }
 0x248   : > { %s1491_s3 = smov 2048   ;;  %s1492_s15 = smov 2  }
 0x249   : > { %s1493_s24 = smov 128   ;;  %s1494_s25 = smov 8  }
 0x24a   : > { %p1910_p2 = scmp.ne.s32.totalorder %s1908_s16, 0  ;;  %s1495_s17 = smov 131072  }
 0x24b   : > { %s1496_s11 = smov 0  }
 0x24c   : > { %s810_s6 = scalar_lea.hbm %s1909_s0, %s1036_s7  ;;  %1127 = sst [smem:[#allocation15]] (%p1910_p2), %s1490_s8 }
 0x24d   : > { %1128 = sst [smem:[#allocation15 + $0x1]] (%p1910_p2), %s1491_s3 }
 0x24e   : > { %1129 = sst [smem:[#allocation15 + $0x2]] (%p1910_p2), %s1492_s15 }
 0x24f   : > { %1130 = sst [smem:[#allocation15 + $0x3]] (%p1910_p2), %s1493_s24 }
 0x250   : > { %1131 = sst [smem:[#allocation15 + $0x4]] (%p1910_p2), %s1493_s24 }
 0x251   : > { %1132 = sst [smem:[#allocation15 + $0x5]] (%p1910_p2), %s1494_s25 }
 0x252   : > { %1133 = dma.general (%p1910_p2), %s822_s30, 512, %s810_s6, %s796_s21, %s1495_s17, [#allocation15], %s1496_s11, 0  }
 0x253 PF: > { %s1911_s10 = sld [smem:[#allocation21_spill]]  ;;  %p1150_p6 = scmp.ge.s32.totalorder %s1472_s28, 2 }
 0x254   : > { %s1912_s4 = sld [smem:[#allocation28_spill]] }
 0x259   : > { %s849_s13 = sand.u32 1, %s1911_s10  }
 0x25a   : > { %p1913_p8 = scmp.ne.s32.totalorder %s1912_s4, 0  ;;  %s850_s29 = scalar_lea.sflag [#allocation4], %s849_s13 }
 0x25c   : > { %p1143_p1 = pnand %p1150_p6, %p1913_p8 }
 0x25e   : > { %p1144_p4 = pneg %p1143_p1 }
 0x260   : > { %1427 = dma.done.wait (%p1144_p4), %s850_s29, 512  }
 0x261   : > { %1429 = vsyncadd (%p1144_p4), %s850_s29, 4294966784  ;;  %s25_s28 = sadd.s32 1, %s1472_s28   ;;  %s1914_s12 = sld [smem:[#allocation26_spill]] }
 0x262   : > { %p22_p5 = scmp.ge.s32.totalorder %s25_s28, 10   ;;  %s1915_s16 = sld [smem:[#allocation22_spill]] }
 0x263   : > { %s1916_s23 = sld [smem:[#allocation25_spill]]  ;;  %s1919_s18 = smov %s1436_s19 }
 0x264   : > { %s1917_s14 = sld [smem:[#allocation23_spill]]  ;;  %s1920_s19 = smov %s1440_s20 }
 0x265   : > { %s1918_s9 = sld [smem:[#allocation24_spill]]  ;;  %s1922_s21 = smov %s1448_s22 }
 0x266   : > { %s1924_s24 = smov %s1464_s26  ;;  %s1925_s25 = smov %s1468_s27 }
 0x267   : > { %s1921_s20 = smov %s1914_s12  ;;  %24 = sbr.rel (!%p22_p5) target bundleno = 17 (0x11), region = 133 }
 0x268   : > { %s1923_s22 = smov %s1915_s16 }
 0x26a   : > { %s1926_s26 = smov %s1917_s14 }
 0x26b   : > { %s1927_s27 = smov %s1918_s9 }
 0x26c   :  { %855 = vsyncpa [#allocation3], 1 }
 0x26d   :  { %857 = vsyncpa [#allocation3 + $0x1], 1 }
 0x26e   :  { %858 = vsyncpa [#allocation6], 1 }
 0x26f   :  { %860 = vsyncpa [#allocation6 + $0x1], 1 }
 0x270   :  { %861 = vsyncpa [#allocation9], 1 }
 0x271   :  { %862 = vsyncpa [#allocation4], 1 }
 0x272   :  { %864 = vsyncpa [#allocation4 + $0x1], 1 }

</bundles_post_ra>
